<compile_context>
chip_gen: v6e
topology: v6e:2x2x1
jax: 0.10.0
libtpu: 0.0.40
codegen_flags: <defaults>
</compile_context>

<pallas_src>
import functools

import jax
import jax.numpy as jnp
from jax.experimental import pallas as pl
from jax.experimental.pallas import tpu as pltpu


def _round_up(x, m):
    return (x + m - 1) // m * m


def _gene_embedding_kernel(*refs, with_dropout: bool):
    if with_dropout:
        x_ref, mask_ref, w1t_ref, w1_ref, b1_ref, o_ref, h_ref = refs
    else:
        x_ref, w1t_ref, w1_ref, b1_ref, o_ref, h_ref = refs
        mask_ref = None

    j = pl.program_id(1)

    # Encode once per batch tile; h stays resident in VMEM scratch across the
    # output-column (j) sweep.
    @pl.when(j == 0)
    def _():
        x = x_ref[...]                                   # [TB, G_pad] f32
        if mask_ref is not None:
            x = x * mask_ref[...]                        # mask pre-scaled by 1/(1-p)
        h = jnp.dot(x, w1t_ref[...],                     # [TB, E_pad]
                    preferred_element_type=jnp.float32)
        h_ref[...] = h + b1_ref[...]

    # Decode one lane-dense output tile: out[:, j-block] = h @ W1[:, j-block]
    o_ref[...] = jnp.dot(h_ref[...], w1_ref[...],
                         preferred_element_type=jnp.float32).astype(o_ref.dtype)


def _dropout_mask(key, shape, p):
    """Inverted dropout mask: 0 or 1/(1-p), matching torch.nn.functional.dropout."""
    keep = 1.0 - float(p)
    return jax.random.bernoulli(key, keep, shape).astype(jnp.float32) / keep


def gene_embedding_forward(feature, w1, b1, *, dropout_prob, training=True,
                           rng_key=None):
    """feature: [B, G] f32, w1: [E, G] f32, b1: [E] f32 -> [B, G] f32."""
    B, G = feature.shape
    E, G2 = w1.shape
    assert G == G2 and b1.shape == (E,)

    feature = feature.astype(jnp.float32)
    w1 = w1.astype(jnp.float32)
    b1 = b1.astype(jnp.float32)

    with_dropout = bool(training) and float(dropout_prob) > 0.0
    if with_dropout and rng_key is None:
        rng_key = jax.random.PRNGKey(0)

    # ---- tile plan --------------------------------------------------------
    TB = min(128, _round_up(B, 8))            # batch tile (MXU M dimension)
    B_pad = _round_up(B, TB)
    E_pad = _round_up(E, 128)
    G_pad = _round_up(G, 128)
    TG = min(G_pad, 2048)                     # lane-dense output tile (mult. of 128)
    while G_pad % TG != 0:
        TG -= 128

    # ---- pad operands (zero padding is exact for this computation) --------
    x = jnp.pad(feature, ((0, B_pad - B), (0, G_pad - G)))
    w1_p = jnp.pad(w1, ((0, E_pad - E), (0, G_pad - G)))          # [E_pad, G_pad]
    w1t_p = w1_p.T                                                # [G_pad, E_pad]
    b1_p = jnp.pad(b1, (0, E_pad - E)).reshape(1, E_pad)

    grid = (B_pad // TB, G_pad // TG)

    in_specs = [pl.BlockSpec((TB, G_pad), lambda i, j: (i, 0))]   # x (re-used over j)
    inputs = [x]
    if with_dropout:
        # TODO(synk): in-kernel pltpu.prng_* dropout would avoid materializing
        # the mask in HBM, but those primitives have no CPU/interpret lowering.
        mask = jnp.pad(_dropout_mask(rng_key, (B, G), dropout_prob),
                       ((0, B_pad - B), (0, G_pad - G)))
        in_specs.append(pl.BlockSpec((TB, G_pad), lambda i, j: (i, 0)))
        inputs.append(mask)
    in_specs += [
        pl.BlockSpec((G_pad, E_pad), lambda i, j: (0, 0)),        # W1^T (resident)
        pl.BlockSpec((E_pad, TG), lambda i, j: (0, j)),           # W1 column tile
        pl.BlockSpec((1, E_pad), lambda i, j: (0, 0)),            # bias
    ]
    inputs += [w1t_p, w1_p, b1_p]

    # ---- VMEM budget (count double buffering on pipelined operands) -------
    f32 = 4
    vmem_bytes = f32 * (
        2 * TB * G_pad                               # x
        + (2 * TB * G_pad if with_dropout else 0)    # dropout mask
        + 2 * G_pad * E_pad                          # W1^T
        + 2 * E_pad * TG                             # W1 column tile
        + 2 * E_pad                                  # bias
        + 2 * TB * TG                                # output tile
        + TB * E_pad                                 # h scratch
    )
    # Keep under v7x's 64 MiB/TC physical VMEM; re-plan tiles if this saturates.
    vmem_limit = int(min(64 << 20, vmem_bytes + (2 << 20)))

    flops = 4 * B * G * E                            # two [B,G]x[G,E]-class matmuls
    bytes_accessed = f32 * (B * G * (3 if with_dropout else 2) + 2 * E * G + E)

    kernel = functools.partial(_gene_embedding_kernel, with_dropout=with_dropout)

    out_pad = pl.pallas_call(
        kernel,
        out_shape=jax.ShapeDtypeStruct((B_pad, G_pad), jnp.float32),
        grid=grid,
        in_specs=in_specs,
        out_specs=pl.BlockSpec((TB, TG), lambda i, j: (i, j)),
        scratch_shapes=[pltpu.VMEM((TB, E_pad), jnp.float32)],
        compiler_params=pltpu.CompilerParams(
            dimension_semantics=("parallel", "arbitrary"),
            vmem_limit_bytes=vmem_limit),
        cost_estimate=pl.CostEstimate(flops=flops, transcendentals=0,
                                      bytes_accessed=bytes_accessed),
    )(*inputs)

    return out_pad[:B, :G]


if __name__ == "__main__":
    # Small, TPU-friendly shapes consistent with the module.
    batch_size = 8
    gene_n = 256
    embedding_size = 128
    dropout_prob = 0.1

    key = jax.random.PRNGKey(0)
    k_x, k_w, k_b, k_drop = jax.random.split(key, 4)

    feature = jax.random.normal(k_x, (batch_size, gene_n), dtype=jnp.float32)
    # PyTorch Linear init style: weight [E, G], bias [E].
    bound = 1.0 / jnp.sqrt(gene_n)
    w1 = jax.random.uniform(k_w, (embedding_size, gene_n),
                            minval=-bound, maxval=bound, dtype=jnp.float32)
    b1 = jax.random.uniform(k_b, (embedding_size,),
                            minval=-bound, maxval=bound, dtype=jnp.float32)

    hi = jax.lax.Precision.HIGHEST

    # Eval mode (dropout is identity): verify against a pure-JAX reference.
    out_eval = jax.block_until_ready(
        gene_embedding_forward(feature, w1, b1,
                               dropout_prob=dropout_prob, training=False))
    h_ref = jnp.dot(feature, w1.T, precision=hi) + b1
    ref_eval = jnp.dot(h_ref, w1, precision=hi)
    assert out_eval.shape == (batch_size, gene_n)
    assert jnp.allclose(out_eval, ref_eval, atol=2e-3, rtol=2e-3), "eval mismatch"

    # Training mode: the dropout mask is deterministic given the key, so the
    # exact reference can be reproduced outside the kernel.
    out_train = jax.block_until_ready(
        gene_embedding_forward(feature, w1, b1, dropout_prob=dropout_prob,
                               training=True, rng_key=k_drop))
    mask = _dropout_mask(k_drop, (batch_size, gene_n), dropout_prob)
    h_ref = jnp.dot(feature * mask, w1.T, precision=hi) + b1
    ref_train = jnp.dot(h_ref, w1, precision=hi)
    assert out_train.shape == (batch_size, gene_n)
    assert jnp.allclose(out_train, ref_train, atol=2e-3, rtol=2e-3), "train mismatch"

    print("KERNEL_OK")
</pallas_src>

<mosaic_0001>
module attributes {stable_mosaic.version = 11 : i64} {
  func.func @_gene_embedding_kernel(%arg0: i32, %arg1: i32, %arg2: memref<8x256xf32, #tpu.memory_space<vmem>>, %arg3: memref<256x128xf32, #tpu.memory_space<vmem>>, %arg4: memref<128x256xf32, #tpu.memory_space<vmem>>, %arg5: memref<1x128xf32, #tpu.memory_space<vmem>>, %arg6: memref<8x256xf32, #tpu.memory_space<vmem>>, %arg7: memref<8x128xf32, #tpu.memory_space<vmem>>) attributes {dimension_semantics = [#tpu.dimension_semantics<parallel>, #tpu.dimension_semantics<arbitrary>], iteration_bounds = array<i64: 1, 1>, scalar_prefetch = 0 : i64, scratch_operands = 1 : i64, tpu.core_type = #tpu.core_type<tc>, window_params = [{transform_indices = @transform_0, window_bounds = array<i64: 8, 256>}, {pipeline_mode = #tpu.pipeline_mode<synchronous>, transform_indices = @transform_1, window_bounds = array<i64: 256, 128>}, {transform_indices = @transform_2, window_bounds = array<i64: 128, 256>}, {pipeline_mode = #tpu.pipeline_mode<synchronous>, transform_indices = @transform_3, window_bounds = array<i64: 1, 128>}, {transform_indices = @transform_4, window_bounds = array<i64: 8, 256>}]} {
    %c0_i32 = arith.constant 0 : i32
    %0 = arith.cmpi eq, %arg1, %c0_i32 : i32
    %1 = arith.extui %0 : i1 to i32
    %c0_i32_0 = arith.constant 0 : i32
    %2 = arith.cmpi ne, %1, %c0_i32_0 : i32
    scf.if %2 {
      %c0_6 = arith.constant 0 : index
      %c0_7 = arith.constant 0 : index
      %7 = vector.load %arg2[%c0_6, %c0_7] : memref<8x256xf32, #tpu.memory_space<vmem>>, vector<8x256xf32>
      %c0_8 = arith.constant 0 : index
      %c0_9 = arith.constant 0 : index
      %8 = vector.load %arg3[%c0_8, %c0_9] : memref<256x128xf32, #tpu.memory_space<vmem>>, vector<256x128xf32>
      %cst_10 = arith.constant dense<0.000000e+00> : vector<8x128xf32>
      %9 = tpu.matmul %7, %8, %cst_10 {dimension_numbers = #tpu.dot_dimension_numbers<[1], [0], [0], [1], [0, 0, 1, 1], [], []>} : vector<8x256xf32>, vector<256x128xf32>, vector<8x128xf32> -> vector<8x128xf32>
      %c0_11 = arith.constant 0 : index
      %c0_12 = arith.constant 0 : index
      %10 = vector.load %arg5[%c0_11, %c0_12] : memref<1x128xf32, #tpu.memory_space<vmem>>, vector<1x128xf32>
      %11 = vector.broadcast %10 : vector<1x128xf32> to vector<8x128xf32>
      %12 = arith.addf %9, %11 : vector<8x128xf32>
      %c0_13 = arith.constant 0 : index
      %c0_14 = arith.constant 0 : index
      %13 = vector.load %arg7[%c0_13, %c0_14] : memref<8x128xf32, #tpu.memory_space<vmem>>, vector<8x128xf32>
      tpu.vector_store %arg7[%c0_13, %c0_14], %12 {strides = array<i32>} : memref<8x128xf32, #tpu.memory_space<vmem>>, vector<8x128xf32>,
    } else {
    }
    %c0 = arith.constant 0 : index
    %c0_1 = arith.constant 0 : index
    %3 = vector.load %arg7[%c0, %c0_1] : memref<8x128xf32, #tpu.memory_space<vmem>>, vector<8x128xf32>
    %c0_2 = arith.constant 0 : index
    %c0_3 = arith.constant 0 : index
    %4 = vector.load %arg4[%c0_2, %c0_3] : memref<128x256xf32, #tpu.memory_space<vmem>>, vector<128x256xf32>
    %cst = arith.constant dense<0.000000e+00> : vector<8x256xf32>
    %5 = tpu.matmul %3, %4, %cst {dimension_numbers = #tpu.dot_dimension_numbers<[1], [0], [0], [1], [0, 0, 1, 1], [], []>} : vector<8x128xf32>, vector<128x256xf32>, vector<8x256xf32> -> vector<8x256xf32>
    %c0_4 = arith.constant 0 : index
    %c0_5 = arith.constant 0 : index
    %6 = vector.load %arg6[%c0_4, %c0_5] : memref<8x256xf32, #tpu.memory_space<vmem>>, vector<8x256xf32>
    tpu.vector_store %arg6[%c0_4, %c0_5], %5 {strides = array<i32>} : memref<8x256xf32, #tpu.memory_space<vmem>>, vector<8x256xf32>,
    return
  }
  func.func @transform_0(%arg0: i32, %arg1: i32) -> (i32, i32) {
    %c0_i32 = arith.constant 0 : i32
    %c0_i32_0 = arith.constant 0 : i32
    return %arg0, %c0_i32 : i32, i32
  }
  func.func @transform_1(%arg0: i32, %arg1: i32) -> (i32, i32) {
    %c0_i32 = arith.constant 0 : i32
    %c0_i32_0 = arith.constant 0 : i32
    %c0_i32_1 = arith.constant 0 : i32
    return %c0_i32, %c0_i32_0 : i32, i32
  }
  func.func @transform_2(%arg0: i32, %arg1: i32) -> (i32, i32) {
    %c0_i32 = arith.constant 0 : i32
    %c0_i32_0 = arith.constant 0 : i32
    return %c0_i32, %arg1 : i32, i32
  }
  func.func @transform_3(%arg0: i32, %arg1: i32) -> (i32, i32) {
    %c0_i32 = arith.constant 0 : i32
    %c0_i32_0 = arith.constant 0 : i32
    %c0_i32_1 = arith.constant 0 : i32
    return %c0_i32, %c0_i32_0 : i32, i32
  }
  func.func @transform_4(%arg0: i32, %arg1: i32) -> (i32, i32) {
    %c0_i32 = arith.constant 0 : i32
    return %arg0, %arg1 : i32, i32
  }
}

</mosaic_0001>

<bundles_post_ra>
// kernel: tpu_custom_call.1
= control target key start
LH: loop header
LB: loop body
LE: loop exit
PB: predicated region body
PF: predicated region fallthrough
CT: control target
= control target key end

     0   :  { %9 = vsyncpa [#allocation4], 0  ;;  %s475_s0 = inlined_call_operand.hbm [shape: f32[8,256], index: 0, kind: input, shape index: {}]   ;;  %s476_s1 = inlined_call_operand.hbm [shape: f32[256,128], index: 1, kind: input, shape index: {}]   ;;  %s477_s2 = inlined_call_operand.hbm [shape: f32[128,256], index: 2, kind: input, shape index: {}]   ;;  %s478_s3 = inlined_call_operand.vmem [shape: f32[1,128], index: 3, kind: input, shape index: {}]   ;;  %s479_s4 = inlined_call_operand.hbm [shape: f32[8,256], index: 4, kind: output, shape index: {}]  }
   0x1   :  { %10 = vsyncpa [#allocation7], 0 }
   0x2   :  { %11 = vsyncpa [#allocation5], 0  ;;  %s426_s15 = smov [#allocation6]  }
   0x3   :  { %s27_s16 = sshll.u32 %s426_s15, 4  ;;  %s28_s16 = int_to_ptr.vmem [resolvable:$true] %s27_s16 }
   0x4   :  { %s348_s17 = scalar_lea.vmem %s28_s16, 4096  ;;  %p353_p1 = scmp.lt.s32.totalorder %s28_s16, %s28_s16 }
   0x5   :  { %p349_p0 = scmp.ne.s32.totalorder %s28_s16, %s348_s17  ;;  %p354_p2 = scmp.lt.s32.totalorder %s348_s17, %s348_s17 }
   0x7   :  { %p355_p3 = por %p354_p2, %p353_p1 }
   0x9   :  { %p356_p4 = pnand %p355_p3, %p349_p0 }
   0xb   :  { %359 = shalt.err (!%p356_p4)
}
   0xc   :  { %s427_s18 = smov 128   ;;  %s428_s19 = smov 8  }
   0xd   :  { %33 = dma.hbm_to_vmem [thread:$0]  %s476_s1, 4096, %s28_s16, [#allocation7], %s427_s18, %s427_s18, %s428_s19  }
   0xe   :  { %s429_s22 = smov [#allocation3]   ;;  %s430_s24 = smov [#allocation8]  }
   0xf   :  { %s18_s23 = sshll.u32 %s429_s22, 4  ;;  %s39_s25 = sshll.u32 %s430_s24, 4  ;;  %s19_s23 = int_to_ptr.vmem [resolvable:$true] %s18_s23  ;;  %s40_s25 = int_to_ptr.vmem [resolvable:$true] %s39_s25 }
  0x10   :  { %s368_s26 = scalar_lea.vmem %s19_s23, 256  ;;  %p373_p6 = scmp.lt.s32.totalorder %s19_s23, %s19_s23 }
  0x11   :  { %p369_p5 = scmp.ne.s32.totalorder %s19_s23, %s368_s26  ;;  %p374_p7 = scmp.lt.s32.totalorder %s368_s26, %s368_s26 }
  0x13   :  { %p375_p8 = por %p374_p7, %p373_p6 }
  0x15   :  { %p376_p9 = pnand %p375_p8, %p369_p5 }
  0x17   :  { %379 = shalt.err (!%p376_p9)
}
  0x18   :  { %21 = dma.hbm_to_vmem [thread:$0]  %s475_s0, 256, %s19_s23, [#allocation4]  }
  0x19   :  { %s388_s29 = scalar_lea.vmem %s40_s25, 4096  ;;  %p393_p11 = scmp.lt.s32.totalorder %s40_s25, %s40_s25 }
  0x1a   :  { %p389_p10 = scmp.ne.s32.totalorder %s40_s25, %s388_s29  ;;  %p394_p12 = scmp.lt.s32.totalorder %s388_s29, %s388_s29 }
  0x1c   :  { %p395_p13 = por %p394_p12, %p393_p11 }
  0x1e   :  { %p396_p0 = pnand %p395_p13, %p389_p10 }
  0x20   :  { %399 = shalt.err (!%p396_p0)
}
  0x21   :  { %s431_s1 = smov 256   ;;  %s432_s30 = smov 16  }
  0x22   :  { %45 = dma.hbm_to_vmem [thread:$0]  %s477_s2, 4096, %s40_s25, [#allocation7], %s431_s1, %s431_s1, %s432_s30  }
  0x23   :  { %420 = dma.done.wait [#allocation4], 256  }
  0x24   :  { %421 = vsyncadd [#allocation4], 4294967040 }
  0x25   :  { %422 = dma.done.wait [#allocation7], 8192  }
  0x26   :  { %423 = vsyncadd [#allocation7], 4294959104  ;;  %v94_v0 = vld [vmem:[#allocation6 + $0xf8] sm:$0xff]  ;;  %v93_v2 = vld [vmem:[#allocation6 + $0xf0] sm:$0xff]  ;;  %s434_s7 = smov [#allocation9]  }
  0x27   :  { %v78_v1 = vld [vmem:[#allocation6 + $0x78] sm:$0xff]  ;;  %296 = vmatprep.subr.mxu0 %v94_v0  ;;  %v77_v3 = vld [vmem:[#allocation6 + $0x70] sm:$0xff]  ;;  %v92_v4 = vld [vmem:[#allocation6 + $0xe8] sm:$0xff]  ;;  %s285_s8 = sshll.u32 %s434_s7, 4  ;;  %s286_s8 = int_to_ptr.vmem [resolvable:$true] %s285_s8 }
  0x28   :  { %297 = vmatpush3.msra.mxu0 %v78_v1  ;;  %v76_v5 = vld [vmem:[#allocation6 + $0x68] sm:$0xff]  ;;  %v91_v6 = vld [vmem:[#allocation6 + $0xe0] sm:$0xff]  ;;  %v90_v8 = vld [vmem:[#allocation6 + $0xd8] sm:$0xff]  ;;  %s400_s9 = scalar_lea.vmem %s286_s8, 256  ;;  %p405_p2 = scmp.lt.s32.totalorder %s286_s8, %s286_s8 }
  0x29   :  { %298 = vmatprep.subr.mxu0 %v93_v2  ;;  %v75_v7 = vld [vmem:[#allocation6 + $0x60] sm:$0xff]  ;;  %v74_v9 = vld [vmem:[#allocation6 + $0x58] sm:$0xff]  ;;  %v89_v10 = vld [vmem:[#allocation6 + $0xd0] sm:$0xff]  ;;  %v433_v2 = vmov 0.0   ;;  %p401_p1 = scmp.ne.s32.totalorder %s286_s8, %s400_s9  ;;  %p406_p3 = scmp.lt.s32.totalorder %s400_s9, %s400_s9 }
  0x2a   :  { %299 = vmatpush3.msra.mxu0 %v77_v3  ;;  %v73_v11 = vld [vmem:[#allocation6 + $0x50] sm:$0xff]  ;;  %v88_v12 = vld [vmem:[#allocation6 + $0xc8] sm:$0xff]  ;;  %v62_v13 = vld [vmem:[#allocation3 + $0x8] sm:$0xff]  ;;  %270 = vmatprep.mubr.f32.mxu1 %v433_v2 }
  0x2b   :  { %300 = vmatprep.subr.mxu0 %v92_v4  ;;  %v72_v14 = vld [vmem:[#allocation6 + $0x48] sm:$0xff]  ;;  %166 = vmatprep.mubr.f32.mxu0 %v62_v13  ;;  %v205_v15 = vld [vmem:[#allocation8 + $0xf8] sm:$0xff]  ;;  %v204_v16 = vld [vmem:[#allocation8 + $0xf0] sm:$0xff]  ;;  %p407_p4 = por %p406_p3, %p405_p2 }
  0x2c   :  { %301 = vmatpush3.msra.mxu0 %v76_v5  ;;  %v87_v17 = vld [vmem:[#allocation6 + $0xc0] sm:$0xff]  ;;  %206 = vmatprep.subr.mxu1 %v205_v15  ;;  %v203_v18 = vld [vmem:[#allocation8 + $0xe8] sm:$0xff]  ;;  %v201_v21 = vld [vmem:[#allocation8 + $0xd8] sm:$0xff] }
  0x2d   :  { %302 = vmatprep.subr.mxu0 %v91_v6  ;;  %v202_v19 = vld [vmem:[#allocation8 + $0xe0] sm:$0xff]  ;;  %207 = vmatpush1.msra.mxu1 %v204_v16  ;;  %v86_v22 = vld [vmem:[#allocation6 + $0xb8] sm:$0xff]  ;;  %v200_v23 = vld [vmem:[#allocation8 + $0xd0] sm:$0xff]  ;;  %p408_p5 = pnand %p407_p4, %p401_p1 }
  0x2e   :  { %303 = vmatpush3.msra.mxu0 %v75_v7  ;;  %v71_v20 = vld [vmem:[#allocation6 + $0x40] sm:$0xff]  ;;  %208 = vmatprep.subr.mxu1 %v203_v18  ;;  %v70_v24 = vld [vmem:[#allocation6 + $0x38] sm:$0xff]  ;;  %v199_v25 = vld [vmem:[#allocation8 + $0xc8] sm:$0xff] }
  0x2f   :  { %304 = vmatprep.subr.mxu0 %v90_v8  ;;  %209 = vmatpush1.msra.mxu1 %v202_v19  ;;  %v85_v26 = vld [vmem:[#allocation6 + $0xb0] sm:$0xff]  ;;  %v198_v27 = vld [vmem:[#allocation8 + $0xc0] sm:$0xff]  ;;  %v197_v29 = vld [vmem:[#allocation8 + $0xb8] sm:$0xff] }
  0x30   :  { %305 = vmatpush3.msra.mxu0 %v74_v9  ;;  %210 = vmatprep.subr.mxu1 %v201_v21  ;;  %v69_v28 = vld [vmem:[#allocation6 + $0x30] sm:$0xff]  ;;  %v84_v30 = vld [vmem:[#allocation6 + $0xa8] sm:$0xff]  ;;  %v83_v34 = vld [vmem:[#allocation6 + $0xa0] sm:$0xff] }
  0x31   :  { %306 = vmatprep.subr.mxu0 %v89_v10  ;;  %211 = vmatpush1.msra.mxu1 %v200_v23  ;;  %v196_v31 = vld [vmem:[#allocation8 + $0xb0] sm:$0xff]  ;;  %v68_v32 = vld [vmem:[#allocation6 + $0x28] sm:$0xff]  ;;  %v194_v35 = vld [vmem:[#allocation8 + $0xa0] sm:$0xff] }
  0x32   :  { %307 = vmatpush3.msra.mxu0 %v73_v11  ;;  %212 = vmatprep.subr.mxu1 %v199_v25  ;;  %v195_v33 = vld [vmem:[#allocation8 + $0xa8] sm:$0xff]  ;;  %v67_v36 = vld [vmem:[#allocation6 + $0x20] sm:$0xff]  ;;  %v193_v37 = vld [vmem:[#allocation8 + $0x98] sm:$0xff] }
  0x33   :  { %308 = vmatprep.subr.mxu0 %v88_v12  ;;  %213 = vmatpush1.msra.mxu1 %v198_v27  ;;  %v82_v38 = vld [vmem:[#allocation6 + $0x98] sm:$0xff]  ;;  %v192_v39 = vld [vmem:[#allocation8 + $0x90] sm:$0xff]  ;;  %v191_v41 = vld [vmem:[#allocation8 + $0x88] sm:$0xff] }
  0x34   :  { %309 = vmatpush3.msra.mxu0 %v72_v14  ;;  %214 = vmatprep.subr.mxu1 %v197_v29  ;;  %v66_v40 = vld [vmem:[#allocation6 + $0x18] sm:$0xff]  ;;  %v81_v42 = vld [vmem:[#allocation6 + $0x90] sm:$0xff]  ;;  %v190_v43 = vld [vmem:[#allocation8 + $0x80] sm:$0xff] }
  0x35   :  { %310 = vmatprep.subr.mxu0 %v87_v17  ;;  %215 = vmatpush1.msra.mxu1 %v196_v31  ;;  %v65_v44 = vld [vmem:[#allocation6 + $0x10] sm:$0xff]  ;;  %v189_v45 = vld [vmem:[#allocation8 + $0x78] sm:$0xff]  ;;  %v80_v46 = vld [vmem:[#allocation6 + $0x88] sm:$0xff] }
  0x36   :  { %311 = vmatpush3.msra.mxu0 %v71_v20  ;;  %216 = vmatprep.subr.mxu1 %v195_v33  ;;  %v188_v47 = vld [vmem:[#allocation8 + $0x70] sm:$0xff]  ;;  %v64_v48 = vld [vmem:[#allocation6 + $0x8] sm:$0xff]  ;;  %v79_v50 = vld [vmem:[#allocation6 + $0x80] sm:$0xff] }
  0x37   :  { %312 = vmatprep.subr.mxu0 %v86_v22  ;;  %217 = vmatpush1.msra.mxu1 %v194_v35  ;;  %v187_v49 = vld [vmem:[#allocation8 + $0x68] sm:$0xff]  ;;  %v186_v51 = vld [vmem:[#allocation8 + $0x60] sm:$0xff]  ;;  %v185_v53 = vld [vmem:[#allocation8 + $0x58] sm:$0xff] }
  0x38   :  { %313 = vmatpush3.msra.mxu0 %v70_v24  ;;  %218 = vmatprep.subr.mxu1 %v193_v37  ;;  %v63_v52 = vld [vmem:[#allocation6] sm:$0xff]  ;;  %v61_v54 = vld [vmem:[#allocation3] sm:$0xff]  ;;  %v183_v56 = vld [vmem:[#allocation8 + $0x48] sm:$0xff] }
  0x39   :  { %314 = vmatprep.subr.mxu0 %v85_v26  ;;  %219 = vmatpush1.msra.mxu1 %v192_v39  ;;  %v184_v55 = vld [vmem:[#allocation8 + $0x50] sm:$0xff]  ;;  %v182_v57 = vld [vmem:[#allocation8 + $0x40] sm:$0xff]  ;;  %v181_v58 = vld [vmem:[#allocation8 + $0x38] sm:$0xff] }
  0x3a   :  { %315 = vmatpush3.msra.mxu0 %v69_v28  ;;  %220 = vmatprep.subr.mxu1 %v191_v41  ;;  %v180_v59 = vld [vmem:[#allocation8 + $0x30] sm:$0xff]  ;;  %v179_v60 = vld [vmem:[#allocation8 + $0x28] sm:$0xff]  ;;  %v178_v61 = vld [vmem:[#allocation8 + $0x20] sm:$0xff] }
  0x3b   :  { %316 = vmatprep.subr.mxu0 %v84_v30  ;;  %221 = vmatpush1.msra.mxu1 %v190_v43  ;;  %v177_v62 = vld [vmem:[#allocation8 + $0x18] sm:$0xff]  ;;  %v176_v63 = vld [vmem:[#allocation8 + $0x10] sm:$0xff]  ;;  %v175_v0 = vld [vmem:[#allocation8 + $0x8] sm:$0xff] }
  0x3c   :  { %317 = vmatpush3.msra.mxu0 %v68_v32  ;;  %222 = vmatprep.subr.mxu1 %v189_v45  ;;  %v174_v1 = vld [vmem:[#allocation8] sm:$0xff]  ;;  %v295_v4 = vld [vmem:[%s478_s3] ss:$0 sm:$0xff] }
  0x3d   :  { %318 = vmatprep.subr.mxu0 %v83_v34  ;;  %223 = vmatpush1.msra.mxu1 %v188_v47 }
  0x3e   :  { %319 = vmatpush3.msra.mxu0 %v67_v36  ;;  %224 = vmatprep.subr.mxu1 %v187_v49 }
  0x3f   :  { %320 = vmatprep.subr.mxu0 %v82_v38  ;;  %225 = vmatpush1.msra.mxu1 %v186_v51 }
  0x40   :  { %321 = vmatpush3.msra.mxu0 %v66_v40  ;;  %226 = vmatprep.subr.mxu1 %v185_v53 }
  0x41   :  { %322 = vmatprep.subr.mxu0 %v81_v42  ;;  %227 = vmatpush1.msra.mxu1 %v184_v55 }
  0x42   :  { %323 = vmatpush3.msra.mxu0 %v65_v44  ;;  %228 = vmatprep.subr.mxu1 %v183_v56 }
  0x43   :  { %324 = vmatprep.subr.mxu0 %v80_v46  ;;  %229 = vmatpush1.msra.mxu1 %v182_v57 }
  0x44   :  { %325 = vmatpush3.msra.mxu0 %v64_v48  ;;  %230 = vmatprep.subr.mxu1 %v181_v58 }
  0x45   :  { %326 = vmatprep.subr.mxu0 %v79_v50  ;;  %231 = vmatpush1.msra.mxu1 %v180_v59 }
  0x46   :  { %327 = vmatpush3.msra.mxu0 %v63_v52  ;;  %232 = vmatprep.subr.mxu1 %v179_v60 }
  0x47   :  { %167 = vmatmul.mubr.f32.vlgmr.msra.gmra.mxu0 %v61_v54  ;;  %233 = vmatpush1.msra.mxu1 %v178_v61 }
  0x48   :  { %234 = vmatprep.subr.mxu1 %v177_v62 }
  0x49   :  { %235 = vmatpush1.msra.mxu1 %v176_v63 }
  0x4a   :  { %236 = vmatprep.subr.mxu1 %v175_v0 }
  0x4b   :  { %237 = vmatpush1.msra.mxu1 %v174_v1 }
 0x107   :  { %v328_v3 = vpop.f32.mrf.mxu0 }
 0x109   :  { %v329_v5 = vpop.f32.mrf.mxu0 }
 0x10a   :  { %v330_v6 = vadd.f32 %v329_v5, %v328_v3 }
 0x10c   :  { %v169_v7 = vadd.f32 %v330_v6, %v295_v4 }
 0x10e   :  { %271 = vmatmul.mubr.f32.vlgmr.msra.gmra.mxu1 %v169_v7 }
 0x1ce   :  { %v272_v8 = vpop.f32.mrf.mxu1 }
 0x1cf   :  { %277 = vst [vmem:[#allocation9] sm:$0xff] %v272_v8 }
 0x1d0   :  { %v274_v9 = vpop.f32.mrf.mxu1 }
 0x1d1   :  { %278 = vst [vmem:[#allocation9 + $0x8] sm:$0xff] %v274_v9 }
 0x1d2   :  { %411 = shalt.err (!%p408_p5)
}
 0x1d3   :  { %288 = dma.vmem_to_hbm [thread:$0]  %s286_s8, 256, %s479_s4, [#allocation5]  }
 0x1d4   :  { %424 = dma.done.wait [#allocation5], 256  }
 0x1d5   :  { %425 = vsyncadd [#allocation5], 4294967040 }
 0x1d6   :  { %292 = vsyncpa [#allocation4], 1 }
 0x1d7   :  { %293 = vsyncpa [#allocation7], 1 }
 0x1d8   :  { %294 = vsyncpa [#allocation5], 1 }

</bundles_post_ra>
